<compile_context>
chip_gen: v7x
topology: tpu7x:2x2x1
jax: 0.10.0
libtpu: 0.0.40
codegen_flags: <defaults>
</compile_context>

<pallas_src>
import functools

import jax
import jax.numpy as jnp
from jax.experimental import pallas as pl
from jax.experimental.pallas import tpu as pltpu


# ---------------------------------------------------------------------------
# shared per-layer math (runs inside the kernels)
# ---------------------------------------------------------------------------
def _gat_layer_compute(x_src, x_dst, w, ws, wd, bias, adj_bias, *,
                       heads, out_channels, concat, apply_elu,
                       negative_slope=0.2):
    """One GATConv layer for a tile of destination nodes.

    x_src   : [Ns, Fin]  features of every source node
    x_dst   : [Nd, Fin]  features of this tile's destination nodes
    adj_bias: [Nd, Ns]   additive mask (0 for edge, -1e30 otherwise), f32
    """
    c = out_channels

    # Projection of all source nodes, every head at once (MXU, bf16 / f32 acc).
    h_src = jnp.dot(x_src.astype(jnp.bfloat16), w.astype(jnp.bfloat16),
                    preferred_element_type=jnp.float32)              # [Ns, H*C]
    h_src_bf = h_src.astype(jnp.bfloat16)

    # Attention logits for ALL heads via two small f32 matmuls; ws/wd fold the
    # per-head <att, h_head> reduction into the projection weights.  A single
    # small [Ns, H] transpose gives the source logits in lane orientation
    # (replaces H separate [N,1] transposes).
    a_src_t = jnp.transpose(
        jnp.dot(x_src, ws, preferred_element_type=jnp.float32))      # [H, Ns]
    a_dst = jnp.dot(x_dst, wd, preferred_element_type=jnp.float32)   # [Nd, H]

    head_outs = []
    for hd in range(heads):
        # e[i, j] = leaky_relu(att_dst . h_i + att_src . h_j), then mask.
        e = a_dst[:, hd:hd + 1] + a_src_t[hd:hd + 1, :]              # [Nd, Ns]
        e = jnp.where(e > 0.0, e, negative_slope * e)
        e = e + adj_bias                                             # off-edge -> -1e30
        m = jnp.max(e, axis=1, keepdims=True)
        p = jnp.exp(e - m)                   # masked entries underflow to exactly 0
        denom = jnp.sum(p, axis=1, keepdims=True)
        # Aggregate first, normalize afterwards (EUP reciprocal, no N^2 divide).
        acc = jnp.dot(p.astype(jnp.bfloat16), h_src_bf[:, hd * c:(hd + 1) * c],
                      preferred_element_type=jnp.float32)            # [Nd, C]
        head_outs.append(acc * pl.reciprocal(denom, approx=True))

    if concat:
        out = jnp.concatenate(head_outs, axis=1)                     # [Nd, H*C]
    else:
        out = head_outs[0]
        for o in head_outs[1:]:
            out = out + o
        out = out * (1.0 / heads)                                    # [Nd, C]

    out = out + bias                                                 # [1, D] broadcast
    if apply_elu:
        out = jnp.where(out > 0.0, out, jnp.exp(jnp.minimum(out, 0.0)) - 1.0)
    return out


# ---------------------------------------------------------------------------
# kernels
# ---------------------------------------------------------------------------
def gat_conv_kernel(x_ref, xd_ref, w_ref, ws_ref, wd_ref, bias_ref, adjb_ref,
                    out_ref, *, heads, out_channels, concat, apply_elu):
    """Single GATConv layer, one destination-node tile per grid step."""
    out = _gat_layer_compute(
        x_ref[...], xd_ref[...], w_ref[...], ws_ref[...], wd_ref[...],
        bias_ref[...], adjb_ref[...].astype(jnp.float32),
        heads=heads, out_channels=out_channels, concat=concat,
        apply_elu=apply_elu)
    out_ref[...] = out.astype(out_ref.dtype)


def gat_fused_kernel(*refs, layer_meta):
    """Whole multi-layer GAT forward in one kernel (small graphs)."""
    out_ref = refs[-1]
    x = refs[0][...]
    adj_bias = refs[1][...].astype(jnp.float32)
    p_refs = refs[2:-1]
    for li, (heads, out_channels, concat, apply_elu) in enumerate(layer_meta):
        w = p_refs[4 * li + 0][...]
        ws = p_refs[4 * li + 1][...]
        wd = p_refs[4 * li + 2][...]
        b = p_refs[4 * li + 3][...]
        x = _gat_layer_compute(x, x, w, ws, wd, b, adj_bias,
                               heads=heads, out_channels=out_channels,
                               concat=concat, apply_elu=apply_elu)
    out_ref[...] = x.astype(out_ref.dtype)


# ---------------------------------------------------------------------------
# wrappers
# ---------------------------------------------------------------------------
def _fold_attention_weights(w, a_src, a_dst, heads, out_channels):
    """ws[:, h] = W_head_h @ att_src[h]  (same for dst) -> [Fin, H]."""
    fin = w.shape[0]
    w3 = w.reshape(fin, heads, out_channels)
    ws = jnp.einsum('fhc,hc->fh', w3, a_src)
    wd = jnp.einsum('fhc,hc->fh', w3, a_dst)
    return ws, wd


def gat_conv_layer(x, w, a_src, a_dst, bias, adj_bias, *, heads, out_channels,
                   concat, apply_elu, tile_n=None):
    """One GATConv layer, tiled over destination nodes (scalable path)."""
    n, fin = x.shape
    hc = heads * out_channels
    out_dim = hc if concat else out_channels
    ws, wd = _fold_attention_weights(w, a_src, a_dst, heads, out_channels)
    bias2d = bias.reshape(1, out_dim)

    # dst tile: keep (adj tile + e/p temporaries + h) x double-buffering well
    # inside v7x's 64 MiB VMEM.  TODO(synk): for very large N also tile the
    # source axis flash-attention style (online softmax with running max/sum).
    if tile_n is None:
        tile_n = n if n <= 256 else 256
    assert n % tile_n == 0, "pad N to a multiple of the dst tile"
    grid = (n // tile_n,)

    kernel = functools.partial(gat_conv_kernel, heads=heads,
                               out_channels=out_channels, concat=concat,
                               apply_elu=apply_elu)
    return pl.pallas_call(
        kernel,
        out_shape=jax.ShapeDtypeStruct((n, out_dim), jnp.float32),
        grid=grid,
        in_specs=[
            pl.BlockSpec((n, fin), lambda i: (0, 0)),        # all source features
            pl.BlockSpec((tile_n, fin), lambda i: (i, 0)),   # this dst tile's features
            pl.BlockSpec((fin, hc), lambda i: (0, 0)),       # W
            pl.BlockSpec((fin, heads), lambda i: (0, 0)),    # W @ att_src (per head)
            pl.BlockSpec((fin, heads), lambda i: (0, 0)),    # W @ att_dst (per head)
            pl.BlockSpec((1, out_dim), lambda i: (0, 0)),    # bias
            pl.BlockSpec((tile_n, n), lambda i: (i, 0)),     # adjacency bias tile
        ],
        out_specs=pl.BlockSpec((tile_n, out_dim), lambda i: (i, 0)),
        compiler_params=pltpu.CompilerParams(
            dimension_semantics=("parallel",)),              # v7x: 2 TCs split tiles
    )(x, x, w, ws, wd, bias2d, adj_bias)


def gat_forward_fused(params, x, adj_bias):
    """All layers in one pallas_call (launch-overhead dominated small graphs)."""
    n, _ = x.shape
    flat = [x, adj_bias]
    layer_meta = []
    num_layers = len(params)
    for i, p in enumerate(params):
        ws, wd = _fold_attention_weights(p['w'], p['a_src'], p['a_dst'],
                                         p['heads'], p['out_channels'])
        out_dim = (p['heads'] * p['out_channels'] if p['concat']
                   else p['out_channels'])
        flat += [p['w'], ws, wd, p['bias'].reshape(1, out_dim)]
        layer_meta.append((p['heads'], p['out_channels'], p['concat'],
                           i < num_layers - 1))
    final = params[-1]
    final_dim = (final['heads'] * final['out_channels'] if final['concat']
                 else final['out_channels'])

    vmem = pl.BlockSpec(memory_space=pltpu.MemorySpace.VMEM)
    kernel = functools.partial(gat_fused_kernel, layer_meta=tuple(layer_meta))
    return pl.pallas_call(
        kernel,
        out_shape=jax.ShapeDtypeStruct((n, final_dim), jnp.float32),
        in_specs=[vmem] * len(flat),
        out_specs=vmem,
    )(*flat)


def gat_forward(params, x, adj_bias, *, fuse=None):
    # TODO(synk): F.dropout is stochastic; treated as identity (inference mode).
    if fuse is None:
        fuse = x.shape[0] <= 256    # whole problem fits VMEM -> single launch
    if fuse:
        return gat_forward_fused(params, x, adj_bias)
    num_layers = len(params)
    for i, p in enumerate(params):
        x = gat_conv_layer(x, p['w'], p['a_src'], p['a_dst'], p['bias'],
                           adj_bias, heads=p['heads'],
                           out_channels=p['out_channels'], concat=p['concat'],
                           apply_elu=(i < num_layers - 1))
    return x


# ---------------------------------------------------------------------------
# parameters & pure-JAX reference
# ---------------------------------------------------------------------------
def init_gat_params(key, in_channels, num_classes, num_hidden, attention_head,
                    num_layers):
    """Deterministic synthetic parameters with the shapes GATConv would have."""
    feature_list = [in_channels, num_hidden, num_classes]
    for _ in range(num_layers - 2):
        feature_list.insert(-1, num_hidden)
    heads = [1] + list(attention_head)
    params = []
    for i in range(len(feature_list) - 1):
        concat = (i != num_layers - 1)
        f_in = feature_list[i] * heads[i]
        c = feature_list[i + 1]
        h = heads[i + 1]
        key, k1, k2, k3, k4 = jax.random.split(key, 5)
        w = jax.random.normal(k1, (f_in, h * c), jnp.float32) * 0.1    # lin weight^T
        a_src = jax.random.normal(k2, (h, c), jnp.float32) * 0.1       # att_src
        a_dst = jax.random.normal(k3, (h, c), jnp.float32) * 0.1       # att_dst
        bias_dim = h * c if concat else c
        bias = jax.random.normal(k4, (bias_dim,), jnp.float32) * 0.1
        params.append(dict(w=w, a_src=a_src, a_dst=a_dst, bias=bias,
                           heads=h, out_channels=c, concat=concat))
    return params


def gat_forward_ref(params, x, adj):
    """Pure-JAX f32 reference with PyG GATConv semantics (dense masked attn)."""
    edge_mask = adj > 0.0
    num_layers = len(params)
    for i, p in enumerate(params):
        h = x @ p['w']
        H, C = p['heads'], p['out_channels']
        outs = []
        for hd in range(H):
            h_hd = h[:, hd * C:(hd + 1) * C]
            a_src = jnp.sum(h_hd * p['a_src'][hd:hd + 1, :], axis=1, keepdims=True)
            a_dst = jnp.sum(h_hd * p['a_dst'][hd:hd + 1, :], axis=1, keepdims=True)
            e = a_dst + a_src.T
            e = jnp.where(e > 0.0, e, 0.2 * e)
            e = jnp.where(edge_mask, e, -1e30)
            m = jnp.max(e, axis=1, keepdims=True)
            pexp = jnp.where(edge_mask, jnp.exp(e - m), 0.0)
            alpha = pexp / jnp.sum(pexp, axis=1, keepdims=True)
            outs.append(alpha @ h_hd)
        if p['concat']:
            out = jnp.concatenate(outs, axis=1) + p['bias']
        else:
            out = sum(outs) / H + p['bias']
        if i < num_layers - 1:
            out = jnp.where(out > 0.0, out, jnp.exp(jnp.minimum(out, 0.0)) - 1.0)
        x = out
    return x


# ---------------------------------------------------------------------------
# driver
# ---------------------------------------------------------------------------
if __name__ == "__main__":
    key = jax.random.PRNGKey(0)
    kx, kp = jax.random.split(key)

    # GAT(in_channels=8, num_classes=4, num_hidden=16,
    #     attention_head=[2, 2], drop_rate=0.5, num_layers=2)
    N = 16
    in_channels, num_hidden, num_classes = 8, 16, 4
    attention_head = [2, 2]
    num_layers = 2

    x = jax.random.normal(kx, (N, in_channels), jnp.float32)

    # edge_index for a bidirectional ring graph (no duplicate edges)
    src = jnp.arange(N, dtype=jnp.int32)
    dst = (src + 1) % N
    edge_src = jnp.concatenate([src, dst])
    edge_dst = jnp.concatenate([dst, src])
    # dense adjacency adj[dst, src]; add self-loops (GATConv add_self_loops=True)
    adj = jnp.zeros((N, N), jnp.float32).at[edge_dst, edge_src].set(1.0)
    adj = adj.at[jnp.arange(N), jnp.arange(N)].set(1.0)
    # additive attention mask, built once, reused by every layer (bf16: half traffic)
    adj_bias = jnp.where(adj > 0.0, 0.0, -1e30).astype(jnp.bfloat16)

    params = init_gat_params(kp, in_channels, num_classes, num_hidden,
                             attention_head, num_layers)

    out_fused = jax.block_until_ready(gat_forward(params, x, adj_bias))
    out_tiled = jax.block_until_ready(gat_forward(params, x, adj_bias, fuse=False))
    ref = jax.block_until_ready(gat_forward_ref(params, x, adj))

    assert out_fused.shape == (N, num_classes), out_fused.shape
    assert out_tiled.shape == (N, num_classes), out_tiled.shape
    # tolerance accounts for bf16 MXU inputs (f32 accumulation) + approx reciprocal
    for out in (out_fused, out_tiled):
        assert bool(jnp.all(jnp.isfinite(out)))
        assert bool(jnp.allclose(out, ref, atol=1e-2, rtol=1e-2)), \
            float(jnp.max(jnp.abs(out - ref)))
    print("KERNEL_OK")
</pallas_src>

<mosaic_0001>
module attributes {stable_mosaic.version = 11 : i64} {
  func.func @gat_fused_kernel(%arg0: memref<16x8xf32, #tpu.memory_space<vmem>>, %arg1: memref<16x16xbf16, #tpu.memory_space<vmem>>, %arg2: memref<8x32xf32, #tpu.memory_space<vmem>>, %arg3: memref<8x2xf32, #tpu.memory_space<vmem>>, %arg4: memref<8x2xf32, #tpu.memory_space<vmem>>, %arg5: memref<1x32xf32, #tpu.memory_space<vmem>>, %arg6: memref<32x8xf32, #tpu.memory_space<vmem>>, %arg7: memref<32x2xf32, #tpu.memory_space<vmem>>, %arg8: memref<32x2xf32, #tpu.memory_space<vmem>>, %arg9: memref<1x4xf32, #tpu.memory_space<vmem>>, %arg10: memref<16x4xf32, #tpu.memory_space<vmem>>) attributes {dimension_semantics = [], scalar_prefetch = 0 : i64, scratch_operands = 0 : i64, tpu.core_type = #tpu.core_type<tc>} {
    %c0 = arith.constant 0 : index
    %c0_0 = arith.constant 0 : index
    %0 = vector.load %arg0[%c0, %c0_0] : memref<16x8xf32, #tpu.memory_space<vmem>>, vector<16x8xf32>
    %c0_1 = arith.constant 0 : index
    %c0_2 = arith.constant 0 : index
    %1 = vector.load %arg1[%c0_1, %c0_2] : memref<16x16xbf16, #tpu.memory_space<vmem>>, vector<16x16xbf16>
    %2 = arith.extf %1 : vector<16x16xbf16> to vector<16x16xf32>
    %c0_3 = arith.constant 0 : index
    %c0_4 = arith.constant 0 : index
    %3 = vector.load %arg2[%c0_3, %c0_4] : memref<8x32xf32, #tpu.memory_space<vmem>>, vector<8x32xf32>
    %c0_5 = arith.constant 0 : index
    %c0_6 = arith.constant 0 : index
    %4 = vector.load %arg3[%c0_5, %c0_6] : memref<8x2xf32, #tpu.memory_space<vmem>>, vector<8x2xf32>
    %c0_7 = arith.constant 0 : index
    %c0_8 = arith.constant 0 : index
    %5 = vector.load %arg4[%c0_7, %c0_8] : memref<8x2xf32, #tpu.memory_space<vmem>>, vector<8x2xf32>
    %c0_9 = arith.constant 0 : index
    %c0_10 = arith.constant 0 : index
    %6 = vector.load %arg5[%c0_9, %c0_10] : memref<1x32xf32, #tpu.memory_space<vmem>>, vector<1x32xf32>
    %7 = arith.truncf %0 : vector<16x8xf32> to vector<16x8xbf16>
    %8 = arith.truncf %3 : vector<8x32xf32> to vector<8x32xbf16>
    %cst = arith.constant dense<0.000000e+00> : vector<16x32xf32>
    %9 = tpu.matmul %7, %8, %cst {dimension_numbers = #tpu.dot_dimension_numbers<[1], [0], [0], [1], [0, 0, 1, 1], [], []>} : vector<16x8xbf16>, vector<8x32xbf16>, vector<16x32xf32> -> vector<16x32xf32>
    %10 = arith.truncf %9 : vector<16x32xf32> to vector<16x32xbf16>
    %cst_11 = arith.constant dense<0.000000e+00> : vector<16x2xf32>
    %11 = tpu.matmul %0, %4, %cst_11 {dimension_numbers = #tpu.dot_dimension_numbers<[1], [0], [0], [1], [0, 0, 1, 1], [], []>} : vector<16x8xf32>, vector<8x2xf32>, vector<16x2xf32> -> vector<16x2xf32>
    %12 = tpu.transpose %11, [1, 0] : vector<16x2xf32> -> vector<2x16xf32>
    %cst_12 = arith.constant dense<0.000000e+00> : vector<16x2xf32>
    %13 = tpu.matmul %0, %5, %cst_12 {dimension_numbers = #tpu.dot_dimension_numbers<[1], [0], [0], [1], [0, 0, 1, 1], [], []>} : vector<16x8xf32>, vector<8x2xf32>, vector<16x2xf32> -> vector<16x2xf32>
    %14 = vector.extract_strided_slice %13 {offsets = [0, 0], sizes = [16, 1], strides = [1, 1]} : vector<16x2xf32> to vector<16x1xf32>
    %15 = vector.extract_strided_slice %12 {offsets = [0, 0], sizes = [1, 16], strides = [1, 1]} : vector<2x16xf32> to vector<1x16xf32>
    %16 = vector.broadcast %14 : vector<16x1xf32> to vector<16x16xf32>
    %17 = vector.broadcast %15 : vector<1x16xf32> to vector<16x16xf32>
    %18 = arith.addf %16, %17 : vector<16x16xf32>
    %cst_13 = arith.constant 0.000000e+00 : f32
    %19 = vector.broadcast %cst_13 : f32 to vector<16x16xf32>
    %20 = arith.cmpf ogt, %18, %19 : vector<16x16xf32>
    %cst_14 = arith.constant 2.000000e-01 : f32
    %21 = vector.broadcast %cst_14 : f32 to vector<16x16xf32>
    %22 = arith.mulf %21, %18 : vector<16x16xf32>
    %23 = arith.select %20, %18, %22 : vector<16x16xi1>, vector<16x16xf32>
    %24 = arith.addf %23, %2 : vector<16x16xf32>
    %cst_15 = arith.constant dense<0xFF800000> : vector<16xf32>
    %25 = vector.multi_reduction <maximumf>, %24, %cst_15 [1] : vector<16x16xf32> to vector<16xf32>
    %26 = vector.shape_cast %25 : vector<16xf32> to vector<16x1xf32>
    %27 = vector.broadcast %26 : vector<16x1xf32> to vector<16x16xf32>
    %28 = arith.subf %24, %27 : vector<16x16xf32>
    %29 = math.exp %28 : vector<16x16xf32>
    %cst_16 = arith.constant dense<0.000000e+00> : vector<16xf32>
    %30 = vector.multi_reduction <add>, %29, %cst_16 [1] : vector<16x16xf32> to vector<16xf32>
    %31 = vector.shape_cast %30 : vector<16xf32> to vector<16x1xf32>
    %32 = arith.truncf %29 : vector<16x16xf32> to vector<16x16xbf16>
    %33 = vector.extract_strided_slice %10 {offsets = [0, 0], sizes = [16, 16], strides = [1, 1]} : vector<16x32xbf16> to vector<16x16xbf16>
    %cst_17 = arith.constant dense<0.000000e+00> : vector<16x16xf32>
    %34 = tpu.matmul %32, %33, %cst_17 {dimension_numbers = #tpu.dot_dimension_numbers<[1], [0], [0], [1], [0, 0, 1, 1], [], []>} : vector<16x16xbf16>, vector<16x16xbf16>, vector<16x16xf32> -> vector<16x16xf32>
    %35 = tpu.reciprocal %31 {approx = true} : vector<16x1xf32> -> vector<16x1xf32>
    %36 = vector.broadcast %35 : vector<16x1xf32> to vector<16x16xf32>
    %37 = arith.mulf %34, %36 : vector<16x16xf32>
    %38 = vector.extract_strided_slice %13 {offsets = [0, 1], sizes = [16, 1], strides = [1, 1]} : vector<16x2xf32> to vector<16x1xf32>
    %39 = vector.extract_strided_slice %12 {offsets = [1, 0], sizes = [1, 16], strides = [1, 1]} : vector<2x16xf32> to vector<1x16xf32>
    %40 = vector.broadcast %38 : vector<16x1xf32> to vector<16x16xf32>
    %41 = vector.broadcast %39 : vector<1x16xf32> to vector<16x16xf32>
    %42 = arith.addf %40, %41 : vector<16x16xf32>
    %cst_18 = arith.constant 0.000000e+00 : f32
    %43 = vector.broadcast %cst_18 : f32 to vector<16x16xf32>
    %44 = arith.cmpf ogt, %42, %43 : vector<16x16xf32>
    %cst_19 = arith.constant 2.000000e-01 : f32
    %45 = vector.broadcast %cst_19 : f32 to vector<16x16xf32>
    %46 = arith.mulf %45, %42 : vector<16x16xf32>
    %47 = arith.select %44, %42, %46 : vector<16x16xi1>, vector<16x16xf32>
    %48 = arith.addf %47, %2 : vector<16x16xf32>
    %cst_20 = arith.constant dense<0xFF800000> : vector<16xf32>
    %49 = vector.multi_reduction <maximumf>, %48, %cst_20 [1] : vector<16x16xf32> to vector<16xf32>
    %50 = vector.shape_cast %49 : vector<16xf32> to vector<16x1xf32>
    %51 = vector.broadcast %50 : vector<16x1xf32> to vector<16x16xf32>
    %52 = arith.subf %48, %51 : vector<16x16xf32>
    %53 = math.exp %52 : vector<16x16xf32>
    %cst_21 = arith.constant dense<0.000000e+00> : vector<16xf32>
    %54 = vector.multi_reduction <add>, %53, %cst_21 [1] : vector<16x16xf32> to vector<16xf32>
    %55 = vector.shape_cast %54 : vector<16xf32> to vector<16x1xf32>
    %56 = arith.truncf %53 : vector<16x16xf32> to vector<16x16xbf16>
    %57 = vector.extract_strided_slice %10 {offsets = [0, 16], sizes = [16, 16], strides = [1, 1]} : vector<16x32xbf16> to vector<16x16xbf16>
    %cst_22 = arith.constant dense<0.000000e+00> : vector<16x16xf32>
    %58 = tpu.matmul %56, %57, %cst_22 {dimension_numbers = #tpu.dot_dimension_numbers<[1], [0], [0], [1], [0, 0, 1, 1], [], []>} : vector<16x16xbf16>, vector<16x16xbf16>, vector<16x16xf32> -> vector<16x16xf32>
    %59 = tpu.reciprocal %55 {approx = true} : vector<16x1xf32> -> vector<16x1xf32>
    %60 = vector.broadcast %59 : vector<16x1xf32> to vector<16x16xf32>
    %61 = arith.mulf %58, %60 : vector<16x16xf32>
    %62 = tpu.concatenate %37, %61 in 1 : vector<16x16xf32>, vector<16x16xf32> -> vector<16x32xf32>
    %63 = vector.broadcast %6 : vector<1x32xf32> to vector<16x32xf32>
    %64 = arith.addf %62, %63 : vector<16x32xf32>
    %cst_23 = arith.constant 0.000000e+00 : f32
    %65 = vector.broadcast %cst_23 : f32 to vector<16x32xf32>
    %66 = arith.cmpf ogt, %64, %65 : vector<16x32xf32>
    %cst_24 = arith.constant 0.000000e+00 : f32
    %67 = vector.broadcast %cst_24 : f32 to vector<16x32xf32>
    %68 = arith.minimumf %64, %67 : vector<16x32xf32>
    %69 = math.exp %68 : vector<16x32xf32>
    %cst_25 = arith.constant 1.000000e+00 : f32
    %70 = vector.broadcast %cst_25 : f32 to vector<16x32xf32>
    %71 = arith.subf %69, %70 : vector<16x32xf32>
    %72 = arith.select %66, %64, %71 : vector<16x32xi1>, vector<16x32xf32>
    %c0_26 = arith.constant 0 : index
    %c0_27 = arith.constant 0 : index
    %73 = vector.load %arg6[%c0_26, %c0_27] : memref<32x8xf32, #tpu.memory_space<vmem>>, vector<32x8xf32>
    %c0_28 = arith.constant 0 : index
    %c0_29 = arith.constant 0 : index
    %74 = vector.load %arg7[%c0_28, %c0_29] : memref<32x2xf32, #tpu.memory_space<vmem>>, vector<32x2xf32>
    %c0_30 = arith.constant 0 : index
    %c0_31 = arith.constant 0 : index
    %75 = vector.load %arg8[%c0_30, %c0_31] : memref<32x2xf32, #tpu.memory_space<vmem>>, vector<32x2xf32>
    %c0_32 = arith.constant 0 : index
    %c0_33 = arith.constant 0 : index
    %76 = vector.load %arg9[%c0_32, %c0_33] : memref<1x4xf32, #tpu.memory_space<vmem>>, vector<1x4xf32>
    %77 = arith.truncf %72 : vector<16x32xf32> to vector<16x32xbf16>
    %78 = arith.truncf %73 : vector<32x8xf32> to vector<32x8xbf16>
    %cst_34 = arith.constant dense<0.000000e+00> : vector<16x8xf32>
    %79 = tpu.matmul %77, %78, %cst_34 {dimension_numbers = #tpu.dot_dimension_numbers<[1], [0], [0], [1], [0, 0, 1, 1], [], []>} : vector<16x32xbf16>, vector<32x8xbf16>, vector<16x8xf32> -> vector<16x8xf32>
    %80 = arith.truncf %79 : vector<16x8xf32> to vector<16x8xbf16>
    %cst_35 = arith.constant dense<0.000000e+00> : vector<16x2xf32>
    %81 = tpu.matmul %72, %74, %cst_35 {dimension_numbers = #tpu.dot_dimension_numbers<[1], [0], [0], [1], [0, 0, 1, 1], [], []>} : vector<16x32xf32>, vector<32x2xf32>, vector<16x2xf32> -> vector<16x2xf32>
    %82 = tpu.transpose %81, [1, 0] : vector<16x2xf32> -> vector<2x16xf32>
    %cst_36 = arith.constant dense<0.000000e+00> : vector<16x2xf32>
    %83 = tpu.matmul %72, %75, %cst_36 {dimension_numbers = #tpu.dot_dimension_numbers<[1], [0], [0], [1], [0, 0, 1, 1], [], []>} : vector<16x32xf32>, vector<32x2xf32>, vector<16x2xf32> -> vector<16x2xf32>
    %84 = vector.extract_strided_slice %83 {offsets = [0, 0], sizes = [16, 1], strides = [1, 1]} : vector<16x2xf32> to vector<16x1xf32>
    %85 = vector.extract_strided_slice %82 {offsets = [0, 0], sizes = [1, 16], strides = [1, 1]} : vector<2x16xf32> to vector<1x16xf32>
    %86 = vector.broadcast %84 : vector<16x1xf32> to vector<16x16xf32>
    %87 = vector.broadcast %85 : vector<1x16xf32> to vector<16x16xf32>
    %88 = arith.addf %86, %87 : vector<16x16xf32>
    %cst_37 = arith.constant 0.000000e+00 : f32
    %89 = vector.broadcast %cst_37 : f32 to vector<16x16xf32>
    %90 = arith.cmpf ogt, %88, %89 : vector<16x16xf32>
    %cst_38 = arith.constant 2.000000e-01 : f32
    %91 = vector.broadcast %cst_38 : f32 to vector<16x16xf32>
    %92 = arith.mulf %91, %88 : vector<16x16xf32>
    %93 = arith.select %90, %88, %92 : vector<16x16xi1>, vector<16x16xf32>
    %94 = arith.addf %93, %2 : vector<16x16xf32>
    %cst_39 = arith.constant dense<0xFF800000> : vector<16xf32>
    %95 = vector.multi_reduction <maximumf>, %94, %cst_39 [1] : vector<16x16xf32> to vector<16xf32>
    %96 = vector.shape_cast %95 : vector<16xf32> to vector<16x1xf32>
    %97 = vector.broadcast %96 : vector<16x1xf32> to vector<16x16xf32>
    %98 = arith.subf %94, %97 : vector<16x16xf32>
    %99 = math.exp %98 : vector<16x16xf32>
    %cst_40 = arith.constant dense<0.000000e+00> : vector<16xf32>
    %100 = vector.multi_reduction <add>, %99, %cst_40 [1] : vector<16x16xf32> to vector<16xf32>
    %101 = vector.shape_cast %100 : vector<16xf32> to vector<16x1xf32>
    %102 = arith.truncf %99 : vector<16x16xf32> to vector<16x16xbf16>
    %103 = vector.extract_strided_slice %80 {offsets = [0, 0], sizes = [16, 4], strides = [1, 1]} : vector<16x8xbf16> to vector<16x4xbf16>
    %cst_41 = arith.constant dense<0.000000e+00> : vector<16x4xf32>
    %104 = tpu.matmul %102, %103, %cst_41 {dimension_numbers = #tpu.dot_dimension_numbers<[1], [0], [0], [1], [0, 0, 1, 1], [], []>} : vector<16x16xbf16>, vector<16x4xbf16>, vector<16x4xf32> -> vector<16x4xf32>
    %105 = tpu.reciprocal %101 {approx = true} : vector<16x1xf32> -> vector<16x1xf32>
    %106 = vector.broadcast %105 : vector<16x1xf32> to vector<16x4xf32>
    %107 = arith.mulf %104, %106 : vector<16x4xf32>
    %108 = vector.extract_strided_slice %83 {offsets = [0, 1], sizes = [16, 1], strides = [1, 1]} : vector<16x2xf32> to vector<16x1xf32>
    %109 = vector.extract_strided_slice %82 {offsets = [1, 0], sizes = [1, 16], strides = [1, 1]} : vector<2x16xf32> to vector<1x16xf32>
    %110 = vector.broadcast %108 : vector<16x1xf32> to vector<16x16xf32>
    %111 = vector.broadcast %109 : vector<1x16xf32> to vector<16x16xf32>
    %112 = arith.addf %110, %111 : vector<16x16xf32>
    %cst_42 = arith.constant 0.000000e+00 : f32
    %113 = vector.broadcast %cst_42 : f32 to vector<16x16xf32>
    %114 = arith.cmpf ogt, %112, %113 : vector<16x16xf32>
    %cst_43 = arith.constant 2.000000e-01 : f32
    %115 = vector.broadcast %cst_43 : f32 to vector<16x16xf32>
    %116 = arith.mulf %115, %112 : vector<16x16xf32>
    %117 = arith.select %114, %112, %116 : vector<16x16xi1>, vector<16x16xf32>
    %118 = arith.addf %117, %2 : vector<16x16xf32>
    %cst_44 = arith.constant dense<0xFF800000> : vector<16xf32>
    %119 = vector.multi_reduction <maximumf>, %118, %cst_44 [1] : vector<16x16xf32> to vector<16xf32>
    %120 = vector.shape_cast %119 : vector<16xf32> to vector<16x1xf32>
    %121 = vector.broadcast %120 : vector<16x1xf32> to vector<16x16xf32>
    %122 = arith.subf %118, %121 : vector<16x16xf32>
    %123 = math.exp %122 : vector<16x16xf32>
    %cst_45 = arith.constant dense<0.000000e+00> : vector<16xf32>
    %124 = vector.multi_reduction <add>, %123, %cst_45 [1] : vector<16x16xf32> to vector<16xf32>
    %125 = vector.shape_cast %124 : vector<16xf32> to vector<16x1xf32>
    %126 = arith.truncf %123 : vector<16x16xf32> to vector<16x16xbf16>
    %127 = vector.extract_strided_slice %80 {offsets = [0, 4], sizes = [16, 4], strides = [1, 1]} : vector<16x8xbf16> to vector<16x4xbf16>
    %cst_46 = arith.constant dense<0.000000e+00> : vector<16x4xf32>
    %128 = tpu.matmul %126, %127, %cst_46 {dimension_numbers = #tpu.dot_dimension_numbers<[1], [0], [0], [1], [0, 0, 1, 1], [], []>} : vector<16x16xbf16>, vector<16x4xbf16>, vector<16x4xf32> -> vector<16x4xf32>
    %129 = tpu.reciprocal %125 {approx = true} : vector<16x1xf32> -> vector<16x1xf32>
    %130 = vector.broadcast %129 : vector<16x1xf32> to vector<16x4xf32>
    %131 = arith.mulf %128, %130 : vector<16x4xf32>
    %132 = arith.addf %107, %131 : vector<16x4xf32>
    %cst_47 = arith.constant 5.000000e-01 : f32
    %133 = vector.broadcast %cst_47 : f32 to vector<16x4xf32>
    %134 = arith.mulf %132, %133 : vector<16x4xf32>
    %135 = vector.broadcast %76 : vector<1x4xf32> to vector<16x4xf32>
    %136 = arith.addf %134, %135 : vector<16x4xf32>
    %c0_48 = arith.constant 0 : index
    %c0_49 = arith.constant 0 : index
    %137 = vector.load %arg10[%c0_48, %c0_49] : memref<16x4xf32, #tpu.memory_space<vmem>>, vector<16x4xf32>
    tpu.vector_store %arg10[%c0_48, %c0_49], %136 {strides = array<i32>} : memref<16x4xf32, #tpu.memory_space<vmem>>, vector<16x4xf32>,
    return
  }
}

</mosaic_0001>

<bundles_post_ra>
// kernel: tpu_custom_call.1
= control target key start
LH: loop header
LB: loop body
LE: loop exit
PB: predicated region body
PF: predicated region fallthrough
CT: control target
= control target key end

     0   :  { %vm48_vm0 = vcmask 64512   ;;  %v1141_v0 = vmov 0.0   ;;  %vm52_vm1 = vcmask 1043456   ;;  %vm1142_vm2 = vmmov 0   ;;  %s1146_s25 = smov 16   ;;  %s1347_s4 = inlined_call_operand.vmem [shape: f32[8,2], index: 4, kind: input, shape index: {}]   ;;  %s1348_s2 = inlined_call_operand.vmem [shape: f32[8,32], index: 2, kind: input, shape index: {}]   ;;  %s1349_s0 = inlined_call_operand.vmem [shape: f32[16,8], index: 0, kind: input, shape index: {}]   ;;  %s1350_s3 = inlined_call_operand.vmem [shape: f32[8,2], index: 3, kind: input, shape index: {}]   ;;  %s1351_s1 = inlined_call_operand.vmem [shape: bf16[16,16], index: 1, kind: input, shape index: {}]   ;;  %s1352_s7 = inlined_call_operand.vmem [shape: f32[32,2], index: 7, kind: input, shape index: {}]   ;;  %s1353_s6 = inlined_call_operand.vmem [shape: f32[32,8], index: 6, kind: input, shape index: {}]   ;;  %s1354_s8 = inlined_call_operand.vmem [shape: f32[32,2], index: 8, kind: input, shape index: {}]   ;;  %s1355_s5 = inlined_call_operand.vmem [shape: f32[1,32], index: 5, kind: input, shape index: {}]   ;;  %s1356_s9 = inlined_call_operand.vmem [shape: f32[1,4], index: 9, kind: input, shape index: {}]   ;;  %s1357_s10 = inlined_call_operand.vmem [shape: f32[16,4], index: 10, kind: output, shape index: {}]  }
   0x1   :  { %1007 = vmatprep.subr.bf16.mxu0 %v1141_v0  ;;  %v44_v1 = vld [vmem:[%s1347_s4] sm:$0xff]  ;;  %1009 = vmatprep.mubr.msk.bf16.mxu0 %vm1142_vm2, %v1141_v0  ;;  %v37_v5 = vld [vmem:[%s1349_s0 + $0x8] sm:$0xff]  ;;  %v1143_v9 = vmov 1   ;;  %v1144_v17 = vmov 0   ;;  %v296_v20 = vlaneseq  ;;  %vm310_vm5 = vcmask 130048  }
   0x2   :  { %v42_v2 = vld [vmem:[%s1348_s2] sm:$0xff]  ;;  %1018 = vmatprep.subr.mxu1 %v44_v1  ;;  %1100 = vset.pattern.permute.xlu0 %v1143_v9  ;;  %vm517_vm8 = vcmask 261120   ;;  %vm947_vm15 = vcmask 31744  }
   0x3   :  { %v36_v3 = vld [vmem:[%s1349_s0] sm:$0xff]  ;;  %v47_v4 = vpack.c.bf16 %v42_v2, %v42_v2  ;;  %1019 = vmatpush3.msra.mxu1 %v44_v1  ;;  %v1235_v21 = vshrl.u32 %v296_v20, 7 }
   0x4   :  { %1020 = vmatprep.mubr.msk.f32.mxu1 %vm48_vm0, %v36_v3  ;;  %v43_v6 = vld [vmem:[%s1350_s3] sm:$0xff]  ;;  %v46_v8 = vpack.c.bf16 %v37_v5, %v36_v3  ;;  %1023 = vmatprep.subr.bf16.mxu1 %v1141_v0 }
   0x5   :  { %v54_v7 = vsel %vm52_vm1, %v47_v4, 0  ;;  %1021 = vmatmul.mubr.msk.f32.vlgmr.msra.gmra.mrb[0].mxu1 %vm48_vm0, %v37_v5  ;;  %v388_v23 = vsub.s32 1, %v1235_v21  ;;  %v973_v26 = vld [vmem:[%s1351_s1] sm:$0xff]   ;;  %v298_v40 = vsub.s32 0, %v1235_v21  ;;  %s1145_s1 = smov 112  }
   0x6   :  { %1008 = vmatpush3.bf16.msra.mxu0 %v54_v7  ;;  %1025 = vmatprep.mubr.msk.bf16.mxu1 %vm1142_vm2, %v1141_v0  ;;  %v1243_v30 = vunpack.c.h.bf16 %v973_v26  ;;  %v1245_v31 = vunpack.c.l.bf16 %v973_v26  ;;  %v506_v26 = vld [vmem:[%s1352_s7 + $0x8] sm:$0xff] }
   0x7   :  { %1013 = vmatprep.subr.mxu0 %v43_v6 }
   0x9   :  { %1010 = vmatmul.mubr.msk.bf16.vlgmr.msra.gmra.mrb[0].mxu0 %vm48_vm0, %v46_v8 }
   0xa   :  { %1014 = vmatpush3.msra.mxu0 %v43_v6  ;;  %1015 = vmatprep.mubr.msk.f32.mxu0 %vm48_vm0, %v36_v3 }
   0xb   :  { %1029 = vmatprep.subr.bf16.mxu0 %v1141_v0 }
  0x11   :  { %1016 = vmatmul.mubr.msk.f32.vlgmr.msra.gmra.mrb[4].mxu0 %vm48_vm0, %v37_v5 }
  0x12   :  { %1031 = vmatprep.mubr.msk.bf16.mxu0 %vm1142_vm2, %v1141_v0 }
  0xd8   :  { %v1022_v10 = vpop.f32.mrb[0].mxu1 }
  0xd9   :  { %v277_v11 = vpop.f32.mrb[1].mxu1 }
  0xda   :  { %379 = vperm.xlu0 %1100, %v277_v11  }
  0xdc   :  { %v90_v12 = vpop.f32.mrb[0].mxu0 }
  0xdd   :  { %v1011_v13 = vpop.f32.mrb[1].mxu0 }
  0xde   :  { %v93_v14 = vpop.f32.mrb[2].mxu0  ;;  %383 = vperm.xlu0 %1100, %v1022_v10  }
  0xdf   :  { %v97_v15 = vpack.c.bf16 %v93_v14, %v90_v12  ;;  %v1012_v16 = vpop.f32.mrb[3].mxu0 }
  0xe1   :  { %1024 = vmatpush3.bf16.msra.mxu1 %v97_v15 }
  0xe2   :  { %1101 = vset.pattern.permute.xlu0 %v1144_v17  ;;  %1035 = vmatprep.subr.bf16.mxu1 %v1141_v0 }
  0xe3   :  { %288 = vperm.xlu0 %1101, %v277_v11  }
  0xe4   :  { %v1017_v18 = vpop.f32.mrb[4].mxu0 }
  0xe5   :  { %v170_v19 = vpop.f32.mrb[5].mxu0 }
  0xe6   :  { %179 = vxpose.xlu1.b32.start [1/2] (short) (narrow) %v170_v19, 8 }
  0xe7   :  { %1103 = vset.pattern.permute.xlu0 %v1143_v9 }
  0xea   :  { %180 = vxpose.xlu1.b32.end [2/2] (short) (narrow) %v1017_v18, 8 }
 0x108   :  { %1102 = vset.pattern.permute.xlu1 %v1144_v17 }
 0x109   :  { %293 = vperm.xlu1 %1102, %v1022_v10  }
 0x159   :  { %v380_v22 = vpop.permute.xlu0 %379 }
 0x15d   :  { %v384_v27 = vpop.permute.xlu0 %383 }
 0x162   :  { %v289_v48 = vpop.permute.xlu0 %288 }
 0x166   :  { %v195_v24 = vpop.trf.xlu1 }
 0x167   :  { %v389_v25 = vrot.slane %v195_v24, %v388_v23  ;;  %v299_v41 = vrot.slane %v195_v24, %v298_v40 }
 0x169   :  { %v390_v28 = vadd.f32 %v389_v25, %v380_v22  ;;  %v391_v29 = vadd.f32 %v389_v25, %v384_v27  ;;  %v300_v49 = vadd.f32 %v299_v41, %v289_v48  ;;  %v505_v25 = vld [vmem:[%s1352_s7] sm:$0xff] }
 0x16b   :  { %vm393_vm3 = vcmp.gt.f32.partialorder %v391_v29, 0.0  ;;  %v395_v32 = vmul.f32 0.2, %v391_v29  ;;  %vm392_vm4 = vcmp.gt.f32.partialorder %v390_v28, 0.0  ;;  %v394_v33 = vmul.f32 0.2, %v390_v28 }
 0x16c   :  { %v304_v50 = vmul.f32 0.2, %v300_v49  ;;  %vm302_vm7 = vcmp.gt.f32.partialorder %v300_v49, 0.0 }
 0x16d   :  { %v397_v34 = vsel %vm393_vm3, %v391_v29, %v395_v32  ;;  %v396_v35 = vsel %vm392_vm4, %v390_v28, %v394_v33  ;;  %v1077_v29 = vpack.c.bf16 %v506_v26, %v505_v25  ;;  %v501_v32 = vld [vmem:[%s1353_s6] sm:$0xff]  ;;  %v502_v33 = vld [vmem:[%s1353_s6 + $0x8] sm:$0xff] }
 0x16e   :  { %v399_v36 = vadd.f32 %v1243_v30, %v397_v34  ;;  %v398_v37 = vadd.f32 %v1245_v31, %v396_v35  ;;  %v306_v51 = vsel %vm302_vm7, %v300_v49, %v304_v50  ;;  %v515_v34 = vpack.c.bf16 %v502_v33, %v501_v32  ;;  %v507_v35 = vld [vmem:[%s1352_s7 + $0x10] sm:$0xff] }
 0x16f   :  { %v308_v52 = vadd.f32 %v1245_v31, %v306_v51 }
 0x170   :  { %v403_v38 = vsel %vm310_vm5, %v399_v36, -inf  ;;  %v400_v39 = vsel %vm310_vm5, %v398_v37, -inf }
 0x171   :  { %404 = vmax.xlane.f32.xlu1 %v403_v38  ;;  %401 = vmax.xlane.f32.xlu0 %v400_v39  ;;  %v311_v53 = vsel %vm310_vm5, %v308_v52, -inf  ;;  %v503_v38 = vld [vmem:[%s1353_s6 + $0x10] sm:$0xff]  ;;  %v504_v39 = vld [vmem:[%s1353_s6 + $0x18] sm:$0xff] }
 0x187   :  { %420 = vrot.lane.b32.xlu0 %v97_v15, %s1145_s1 }
 0x188   :  { %v294_v42 = vpop.permute.xlu1 %293 }
 0x189   :  { %v301_v43 = vadd.f32 %v299_v41, %v294_v42  ;;  %v516_v41 = vpack.c.bf16 %v504_v39, %v503_v38  ;;  %v509_v42 = vld [vmem:[%s1354_s8] sm:$0xff] }
 0x18b   :  { %vm303_vm6 = vcmp.gt.f32.partialorder %v301_v43, 0.0  ;;  %v305_v44 = vmul.f32 0.2, %v301_v43 }
 0x18d   :  { %v307_v45 = vsel %vm303_vm6, %v301_v43, %v305_v44  ;;  %v510_v43 = vld [vmem:[%s1354_s8 + $0x8] sm:$0xff] }
 0x18e   :  { %v309_v46 = vadd.f32 %v1243_v30, %v307_v45  ;;  %v1085_v44 = vpack.c.bf16 %v510_v43, %v509_v42 }
 0x190   :  { %v314_v47 = vsel %vm310_vm5, %v309_v46, -inf }
 0x191   :  { %315 = vmax.xlane.f32.xlu1 %v314_v47 }
 0x1a6   :  { %312 = vmax.xlane.f32.xlu0 %v311_v53  ;;  %v961_v53 = vld [vmem:[%s1355_s5] ss:$0 sm:$0xff] }
 0x1fe   :  { %v402_v54 = vpop.xlane.xlu0 %401  ;;  %v405_v55 = vpop.xlane.xlu1 %404 }
 0x1ff   :  { %v406_v56 = vsub.f32 %v398_v37, %v402_v54  ;;  %v407_v57 = vsub.f32 %v399_v36, %v405_v55  ;;  %v508_v36 = vld [vmem:[%s1352_s7 + $0x18] sm:$0xff] }
 0x200   :  { %v1081_v37 = vpack.c.bf16 %v508_v36, %v507_v35 }
 0x201   :  { %v408_v58 = vmul.f32 1.442695, %v406_v56  ;;  %v410_v59 = vmul.f32 1.442695, %v407_v57 }
 0x202   :  { %v421_v60 = vpop.permute.xlu0 %420 }
 0x203   :  { %1105 = vpow2.f32 %v408_v58  ;;  %1030 = vmatpush3.bf16.msra.mxu0 %v421_v60 }
 0x204   :  { %1107 = vpow2.f32 %v410_v59  ;;  %1078 = vmatprep.subr.bf16.mxu0 %v1077_v29 }
 0x20d   :  { %v1106_v61 = vpop.eup %1105 }
 0x20e   :  { %v1108_v62 = vpop.eup %1107  ;;  %v412_v63 = vsel %vm310_vm5, %v1106_v61, 0.0 }
 0x20f   :  { %413 = vadd.xlane.f32.xlu1 %v412_v63  ;;  %v418_v1 = vpack.c.bf16 %v1108_v62, %v1106_v61  ;;  %v415_v2 = vsel %vm310_vm5, %v1108_v62, 0.0 }
 0x211   :  { %1032 = vmatmul.mubr.msk.bf16.vlgmr.msra.gmra.mrb[8].mxu0 %vm310_vm5, %v418_v1 }
 0x212   :  { %1080 = vmatpush3.bf16.msra.mxu0 %v1077_v29 }
 0x213   :  { %416 = vadd.xlane.f32.xlu1 %v415_v2  ;;  %1082 = vmatprep.subr.bf16.mxu0 %v1081_v37 }
 0x216   :  { %1084 = vmatpush3.bf16.msra.mxu0 %v1081_v37 }
 0x217   :  { %1065 = vmatprep.subr.bf16.mxu0 %v1141_v0 }
 0x21e   :  { %v316_v3 = vpop.xlane.xlu1 %315 }
 0x21f   :  { %v318_v4 = vsub.f32 %v309_v46, %v316_v3 }
 0x221   :  { %v321_v5 = vmul.f32 1.442695, %v318_v4 }
 0x223   :  { %1109 = vpow2.f32 %v321_v5 }
 0x22d   :  { %v1110_v6 = vpop.eup %1109 }
 0x22e   :  { %v326_v7 = vsel %vm310_vm5, %v1110_v6, 0.0 }
 0x22f   :  { %327 = vadd.xlane.f32.xlu1 %v326_v7 }
 0x233   :  { %v313_v8 = vpop.xlane.xlu0 %312 }
 0x234   :  { %v317_v10 = vsub.f32 %v308_v52, %v313_v8  ;;  %v511_v8 = vld [vmem:[%s1354_s8 + $0x10] sm:$0xff] }
 0x236   :  { %v319_v11 = vmul.f32 1.442695, %v317_v10  ;;  %v512_v10 = vld [vmem:[%s1354_s8 + $0x18] sm:$0xff]  ;;  %s1147_s8 = smov 124  }
 0x238   :  { %1111 = vpow2.f32 %v319_v11 }
 0x242   :  { %v1112_v12 = vpop.eup %1111 }
 0x243   :  { %v323_v13 = vsel %vm310_vm5, %v1112_v12, 0.0  ;;  %v329_v14 = vpack.c.bf16 %v1110_v6, %v1112_v12 }
 0x244   :  { %324 = vadd.xlane.f32.xlu1 %v323_v13  ;;  %v1089_v13 = vpack.c.bf16 %v512_v10, %v511_v8 }
 0x245   :  { %1026 = vmatmul.mubr.msk.bf16.vlgmr.msra.gmra.mrb[4].mxu1 %vm310_vm5, %v329_v14 }
 0x246   :  { %1039 = vmatprep.mubr.msk.bf16.mxu1 %vm1142_vm2, %v1141_v0  ;;  %1036 = vmatpush3.bf16.msra.mxu1 %v515_v34 }
 0x247   :  { %1037 = vmatprep.subr.bf16.mxu1 %v1141_v0 }
 0x24a   :  { %1038 = vmatpush3.bf16.msra.mxu1 %v516_v41 }
 0x24b   :  { %1086 = vmatprep.subr.bf16.mxu1 %v1085_v44 }
 0x29c   :  { %v414_v15 = vpop.xlane.xlu1 %413 }
 0x29d   :  { %1113 = vrcp.f32 %v414_v15 }
 0x2a0   :  { %v417_v16 = vpop.xlane.xlu1 %416 }
 0x2a1   :  { %1115 = vrcp.f32 %v417_v16 }
 0x2a7   :  { %v1114_v17 = vpop.eup %1113 }
 0x2ab   :  { %v1116_v22 = vpop.eup %1115 }
 0x2bc   :  { %v328_v49 = vpop.xlane.xlu1 %327 }
 0x2d1   :  { %v325_v50 = vpop.xlane.xlu1 %324 }
 0x2d2   :  { %1117 = vrcp.f32 %v325_v50 }
 0x2d3   :  { %1119 = vrcp.f32 %v328_v49 }
 0x2dc   :  { %v1118_v51 = vpop.eup %1117 }
 0x2dd   :  { %v1120_v54 = vpop.eup %1119 }
 0x2e4   :  { %v460_v18 = vpop.f32.mrb[8].mxu0 }
 0x2e5   :  { %v469_v19 = vmul.f32 %v1114_v17, %v460_v18  ;;  %v1033_v20 = vpop.f32.mrb[9].mxu0 }
 0x2e6   :  { %v463_v24 = vpop.f32.mrb[10].mxu0 }
 0x2e7   :  { %v470_v27 = vmul.f32 %v1116_v22, %v463_v24  ;;  %v1034_v28 = vpop.f32.mrb[11].mxu0  ;;  %473 = vrot.lane.b32.xlu1 %v469_v19, %s1146_s25 }
 0x2e9   :  { %475 = vrot.lane.b32.xlu0 %v470_v27, %s1146_s25 }
 0x318   :  { %v367_v45 = vpop.f32.mrb[4].mxu1 }
 0x319   :  { %v1027_v46 = vpop.f32.mrb[5].mxu1  ;;  %v376_v52 = vmul.f32 %v1118_v51, %v367_v45 }
 0x31a   :  { %v370_v47 = vpop.f32.mrb[6].mxu1 }
 0x31b   :  { %v1028_v48 = vpop.f32.mrb[7].mxu1  ;;  %v377_v56 = vmul.f32 %v1120_v54, %v370_v47 }
 0x359   :  { %v474_v55 = vpop.permute.xlu1 %473 }
 0x35a   :  { %v479_v57 = vsel %vm310_vm5, %v376_v52, %v474_v55 }
 0x35b   :  { %v487_v58 = vadd.f32 %v961_v53, %v479_v57  ;;  %v476_v59 = vpop.permute.xlu0 %475 }
 0x35c   :  { %v480_v60 = vsel %vm310_vm5, %v377_v56, %v476_v59 }
 0x35d   :  { %v491_v61 = vmin.f32 %v487_v58, 0.0  ;;  %v488_v62 = vadd.f32 %v961_v53, %v480_v60  ;;  %vm489_vm9 = vcmp.gt.f32.partialorder %v487_v58, 0.0 }
 0x35f   :  { %v493_v63 = vmul.f32 1.442695, %v491_v61  ;;  %v492_v1 = vmin.f32 %v488_v62, 0.0  ;;  %vm490_vm10 = vcmp.gt.f32.partialorder %v488_v62, 0.0 }
 0x361   :  { %1121 = vpow2.f32 %v493_v63  ;;  %v495_v2 = vmul.f32 1.442695, %v492_v1 }
 0x363   :  { %1123 = vpow2.f32 %v495_v2 }
 0x36b   :  { %v1122_v3 = vpop.eup %1121 }
 0x36c   :  { %v962_v4 = vadd.f32 -1.0, %v1122_v3 }
 0x36d   :  { %v1124_v5 = vpop.eup %1123 }
 0x36e   :  { %v963_v6 = vadd.f32 -1.0, %v1124_v5  ;;  %v499_v7 = vsel %vm489_vm9, %v487_v58, %v962_v4 }
 0x36f   :  { %1051 = vmatprep.mubr.msk.f32.mxu0 %vm517_vm8, %v499_v7 }
 0x370   :  { %v500_v11 = vsel %vm490_vm10, %v488_v62, %v963_v6 }
 0x371   :  { %v514_v12 = vpack.c.bf16 %v500_v11, %v499_v7  ;;  %1052 = vmatmul.mubr.msk.f32.vlgmr.msra.gmra.mrb[6].mxu0 %vm517_vm8, %v500_v11 }
 0x372   :  { %1067 = vmatprep.mubr.msk.bf16.mxu0 %vm1142_vm2, %v1141_v0 }
 0x373   :  { %1040 = vmatmul.mubr.msk.bf16.vlgmr.msra.gmra.mrb[8].mxu1 %vm517_vm8, %v514_v12 }
 0x374   :  { %1088 = vmatpush3.bf16.msra.mxu1 %v1085_v44  ;;  %1062 = vmatprep.mubr.msk.f32.mxu1 %vm517_vm8, %v499_v7 }
 0x375   :  { %1090 = vmatprep.subr.bf16.mxu1 %v1089_v13 }
 0x378   :  { %1092 = vmatpush3.bf16.msra.mxu1 %v1089_v13 }
 0x379   :  { %1071 = vmatprep.subr.bf16.mxu1 %v1141_v0 }
 0x37b   :  { %1063 = vmatmul.mubr.msk.f32.vlgmr.msra.gmra.mrb[2].mxu1 %vm517_vm8, %v500_v11 }
 0x37c   :  { %1073 = vmatprep.mubr.msk.bf16.mxu1 %vm1142_vm2, %v1141_v0 }
 0x444   :  { %v1053_v14 = vpop.f32.mrb[6].mxu0 }
 0x445   :  { %v635_v15 = vpop.f32.mrb[7].mxu0 }
 0x446   :  { %v555_v16 = vpop.f32.mrb[8].mxu1 }
 0x447   :  { %v1041_v17 = vpop.f32.mrb[9].mxu1 }
 0x448   :  { %v558_v18 = vpop.f32.mrb[10].mxu1 }
 0x449   :  { %v562_v19 = vpack.c.bf16 %v558_v18, %v555_v16  ;;  %v1042_v20 = vpop.f32.mrb[11].mxu1 }
 0x44b   :  { %1066 = vmatpush3.bf16.msra.mxu0 %v562_v19 }
 0x44e   :  { %v1064_v22 = vpop.f32.mrb[2].mxu1 }
 0x44f   :  { %847 = vperm.xlu0 %1103, %v1064_v22   ;;  %758 = vperm.xlu1 %1102, %v1064_v22   ;;  %v742_v24 = vpop.f32.mrb[3].mxu1 }
 0x453   :  { %753 = vperm.xlu1 %1102, %v742_v24  }
 0x457   :  { %1104 = vset.pattern.permute.xlu1 %v1143_v9 }
 0x458   :  { %843 = vperm.xlu1 %1104, %v742_v24  }
 0x481   :  { %644 = vxpose.xlu1.b32.start [1/2] (short) (narrow) %v635_v15, 8 }
 0x485   :  { %645 = vxpose.xlu1.b32.end [2/2] (short) (narrow) %v1053_v14, 8 }
 0x4ce   :  { %v759_v25 = vpop.permute.xlu1 %758  ;;  %v848_v32 = vpop.permute.xlu0 %847 }
 0x4d2   :  { %v754_v0 = vpop.permute.xlu1 %753 }
 0x4d7   :  { %v844_v26 = vpop.permute.xlu1 %843 }
 0x501   :  { %v660_v27 = vpop.trf.xlu1 }
 0x502   :  { %v764_v28 = vrot.slane %v660_v27, %v298_v40  ;;  %v853_v29 = vrot.slane %v660_v27, %v388_v23 }
 0x504   :  { %v765_v33 = vadd.f32 %v764_v28, %v754_v0  ;;  %v766_v34 = vadd.f32 %v764_v28, %v759_v25  ;;  %v854_v35 = vadd.f32 %v853_v29, %v844_v26  ;;  %v855_v36 = vadd.f32 %v853_v29, %v848_v32 }
 0x506   :  { %vm857_vm11 = vcmp.gt.f32.partialorder %v855_v36, 0.0  ;;  %v859_v9 = vmul.f32 0.2, %v855_v36  ;;  %vm768_vm12 = vcmp.gt.f32.partialorder %v766_v34, 0.0  ;;  %v770_v37 = vmul.f32 0.2, %v766_v34 }
 0x507   :  { %vm767_vm13 = vcmp.gt.f32.partialorder %v765_v33, 0.0  ;;  %v769_v38 = vmul.f32 0.2, %v765_v33  ;;  %v858_v42 = vmul.f32 0.2, %v854_v35  ;;  %vm856_vm14 = vcmp.gt.f32.partialorder %v854_v35, 0.0 }
 0x508   :  { %v861_v39 = vsel %vm857_vm11, %v855_v36, %v859_v9  ;;  %v772_v41 = vsel %vm768_vm12, %v766_v34, %v770_v37 }
 0x509   :  { %v863_v43 = vadd.f32 %v1243_v30, %v861_v39  ;;  %v774_v40 = vadd.f32 %v1243_v30, %v772_v41  ;;  %v771_v21 = vsel %vm767_vm13, %v765_v33, %v769_v38  ;;  %v860_v46 = vsel %vm856_vm14, %v854_v35, %v858_v42  ;;  %v971_v33 = vld [vmem:[%s1356_s9] ss:$0 sm:$0xff] }
 0x50a   :  { %v773_v45 = vadd.f32 %v1245_v31, %v771_v21  ;;  %v862_v48 = vadd.f32 %v1245_v31, %v860_v46 }
 0x50b   :  { %v867_v23 = vsel %vm310_vm5, %v863_v43, -inf  ;;  %v778_v44 = vsel %vm310_vm5, %v774_v40, -inf }
 0x50c   :  { %868 = vmax.xlane.f32.xlu1 %v867_v23  ;;  %779 = vmax.xlane.f32.xlu0 %v778_v44  ;;  %v775_v47 = vsel %vm310_vm5, %v773_v45, -inf  ;;  %v864_v49 = vsel %vm310_vm5, %v862_v48, -inf }
 0x510   :  { %776 = vmax.xlane.f32.xlu0 %v775_v47 }
 0x514   :  { %865 = vmax.xlane.f32.xlu0 %v864_v49 }
 0x52a   :  { %884 = vrot.lane.b32.xlu0 %v562_v19, %s1147_s8 }
 0x599   :  { %v780_v30 = vpop.xlane.xlu0 %779  ;;  %v869_v50 = vpop.xlane.xlu1 %868 }
 0x59a   :  { %v782_v51 = vsub.f32 %v774_v40, %v780_v30  ;;  %v871_v53 = vsub.f32 %v863_v43, %v869_v50 }
 0x59c   :  { %v785_v52 = vmul.f32 1.442695, %v782_v51  ;;  %v874_v57 = vmul.f32 1.442695, %v871_v53 }
 0x59d   :  { %v777_v54 = vpop.xlane.xlu0 %776 }
 0x59e   :  { %v781_v55 = vsub.f32 %v773_v45, %v777_v54  ;;  %1125 = vpow2.f32 %v785_v52 }
 0x5a0   :  { %v783_v56 = vmul.f32 1.442695, %v781_v55 }
 0x5a1   :  { %v866_v58 = vpop.xlane.xlu0 %865 }
 0x5a2   :  { %1127 = vpow2.f32 %v783_v56  ;;  %v870_v59 = vsub.f32 %v862_v48, %v866_v58 }
 0x5a3   :  { %1129 = vpow2.f32 %v874_v57 }
 0x5a4   :  { %v872_v31 = vmul.f32 1.442695, %v870_v59 }
 0x5a5   :  { %v885_v60 = vpop.permute.xlu0 %884 }
 0x5a6   :  { %1131 = vpow2.f32 %v872_v31  ;;  %1072 = vmatpush3.bf16.msra.mxu1 %v885_v60 }
 0x5a8   :  { %v1126_v61 = vpop.eup %1125 }
 0x5a9   :  { %v790_v62 = vsel %vm310_vm5, %v1126_v61, 0.0 }
 0x5aa   :  { %791 = vadd.xlane.f32.xlu1 %v790_v62 }
 0x5ac   :  { %v1128_v63 = vpop.eup %1127 }
 0x5ad   :  { %v787_v1 = vsel %vm310_vm5, %v1128_v63, 0.0  ;;  %v793_v2 = vpack.c.bf16 %v1126_v61, %v1128_v63  ;;  %v1130_v3 = vpop.eup %1129 }
 0x5ae   :  { %788 = vadd.xlane.f32.xlu0 %v787_v1  ;;  %v879_v7 = vsel %vm310_vm5, %v1130_v3, 0.0 }
 0x5af   :  { %1068 = vmatmul.mubr.msk.bf16.vlgmr.msra.gmra.mrb[12].mxu0 %vm310_vm5, %v793_v2 }
 0x5b0   :  { %v1132_v4 = vpop.eup %1131 }
 0x5b1   :  { %v876_v5 = vsel %vm310_vm5, %v1132_v4, 0.0  ;;  %v882_v6 = vpack.c.bf16 %v1130_v3, %v1132_v4 }
 0x5b2   :  { %877 = vadd.xlane.f32.xlu1 %v876_v5 }
 0x5b3   :  { %1074 = vmatmul.mubr.msk.bf16.vlgmr.msra.gmra.mrb[12].mxu1 %vm310_vm5, %v882_v6 }
 0x5b6   :  { %880 = vadd.xlane.f32.xlu1 %v879_v7 }
 0x637   :  { %v792_v8 = vpop.xlane.xlu1 %791 }
 0x63b   :  { %v789_v11 = vpop.xlane.xlu0 %788 }
 0x63c   :  { %1133 = vrcp.f32 %v789_v11 }
 0x63f   :  { %v878_v10 = vpop.xlane.xlu1 %877 }
 0x640   :  { %1135 = vrcp.f32 %v878_v10 }
 0x641   :  { %1137 = vrcp.f32 %v792_v8 }
 0x643   :  { %v881_v12 = vpop.xlane.xlu1 %880 }
 0x644   :  { %1139 = vrcp.f32 %v881_v12 }
 0x646   :  { %v1134_v16 = vpop.eup %1133 }
 0x64a   :  { %v1136_v18 = vpop.eup %1135 }
 0x64b   :  { %v1138_v20 = vpop.eup %1137 }
 0x64e   :  { %v1140_v0 = vpop.eup %1139 }
 0x682   :  { %v831_v13 = vpop.f32.mrb[12].mxu0 }
 0x683   :  { %v1069_v14 = vpop.f32.mrb[13].mxu0  ;;  %v840_v22 = vmul.f32 %v1134_v16, %v831_v13 }
 0x684   :  { %v834_v15 = vpop.f32.mrb[14].mxu0 }
 0x685   :  { %v1070_v17 = vpop.f32.mrb[15].mxu0  ;;  %v841_v27 = vmul.f32 %v1138_v20, %v834_v15 }
 0x686   :  { %v924_v19 = vpop.f32.mrb[12].mxu1 }
 0x687   :  { %v933_v24 = vmul.f32 %v1136_v18, %v924_v19  ;;  %v1075_v25 = vpop.f32.mrb[13].mxu1 }
 0x688   :  { %v927_v26 = vpop.f32.mrb[14].mxu1 }
 0x689   :  { %v935_v28 = vadd.f32 %v933_v24, %v840_v22  ;;  %v934_v29 = vmul.f32 %v1140_v0, %v927_v26  ;;  %v1076_v32 = vpop.f32.mrb[15].mxu1 }
 0x68b   :  { %v937_v34 = vmul.f32 0.5, %v935_v28  ;;  %v936_v35 = vadd.f32 %v934_v29, %v841_v27 }
 0x68d   :  { %v945_v36 = vadd.f32 %v971_v33, %v937_v34  ;;  %v938_v9 = vmul.f32 0.5, %v936_v35 }
 0x68f   :  { %948 = vst.msk [vmem:[%s1357_s10] sm:$0xff] %vm947_vm15, %v945_v36  ;;  %v946_v37 = vadd.f32 %v971_v33, %v938_v9 }
 0x691   :  { %949 = vst.msk [vmem:[%s1357_s10 + $0x8] sm:$0xff] %vm947_vm15, %v946_v37 }

</bundles_post_ra>
